<compile_context>
chip_gen: v7x
topology: tpu7x:2x2x1
jax: 0.10.0
libtpu: 0.0.40
codegen_flags: <defaults>
</compile_context>

<pallas_src>
import functools
import math

import jax
import jax.numpy as jnp
from jax.experimental import pallas as pl
from jax.experimental.pallas import tpu as pltpu


# --------------------------------------------------------------------------
# Kernels
# --------------------------------------------------------------------------
def _layernorm_f32(v, gamma, beta, eps=1e-5):
    mu = jnp.mean(v, axis=-1, keepdims=True)
    var = jnp.mean(jnp.square(v - mu), axis=-1, keepdims=True)
    return (v - mu) * jax.lax.rsqrt(var + eps) * gamma + beta


def qkv_proj_kernel(x_ref, w_ref, b_ref, o_ref):
    """(TM, E) row tile -> (TM, 3E) = x @ Wqkv + b  (bf16 MXU, f32 acc)."""
    acc = jnp.dot(x_ref[...], w_ref[...], preferred_element_type=jnp.float32)
    acc = acc + b_ref[...]
    o_ref[...] = acc.astype(o_ref.dtype)


def attention_kernel(q_ref, kv_ref, o_ref, *, num_heads):
    """Batched-head scaled-dot-product attention for one (batch, q-tile)."""
    E = o_ref.shape[-1]
    TQ = q_ref.shape[1]
    S = kv_ref.shape[1]
    H = num_heads
    D = E // H
    scale = 1.0 / math.sqrt(D)

    q_blk = q_ref[0]           # (TQ, 3E) bf16
    kv_blk = kv_ref[0]         # (S, 3E)  bf16

    # Split heads once: (rows, E) -> (H, rows, D); heads stay batched below.
    qh = jnp.transpose(q_blk[:, 0 * E:1 * E].reshape(TQ, H, D), (1, 0, 2))
    kh = jnp.transpose(kv_blk[:, 1 * E:2 * E].reshape(S, H, D), (1, 0, 2))
    vh = jnp.transpose(kv_blk[:, 2 * E:3 * E].reshape(S, H, D), (1, 0, 2))

    # Fold the 1/sqrt(D) scale into q once (f32 elementwise, bf16 to the MXU).
    qh = (qh.astype(jnp.float32) * scale).astype(jnp.bfloat16)

    s = jnp.einsum("hqd,hkd->hqk", qh, kh,
                   preferred_element_type=jnp.float32)            # (H, TQ, S)
    # TODO(synk): src_mask / src_key_padding_mask support (both None here).
    s = s - jnp.max(s, axis=-1, keepdims=True)
    p = jnp.exp(s)
    denom = jnp.sum(p, axis=-1, keepdims=True)
    p = p * pl.reciprocal(denom, approx=True)                     # EUP divide
    ctx = jnp.einsum("hqk,hkd->hqd", p.astype(jnp.bfloat16), vh,
                     preferred_element_type=jnp.float32)          # (H, TQ, D)
    ctx = jnp.transpose(ctx, (1, 0, 2)).reshape(TQ, E)
    o_ref[0] = ctx.astype(o_ref.dtype)
    # TODO(synk): for long sequences tile KV with an online-softmax
    # accumulator (flash-style) so peak VMEM stays bounded on v7x (64 MiB).


def post_attn_kernel(x_ref, ctx_ref, wo_ref, bo_ref, g1_ref, b1_ref,
                     w1_ref, bf1_ref, w2_ref, bf2_ref, g2_ref, b2_ref,
                     gf_ref, bff_ref, o_ref, *, apply_final_norm):
    """out-proj + residual + LN1 + FFN + residual + LN2 (+ fused final LN)."""
    x = x_ref[...].astype(jnp.float32)                             # (TM, E)

    attn = jnp.dot(ctx_ref[...], wo_ref[...],
                   preferred_element_type=jnp.float32) + bo_ref[...]
    y = _layernorm_f32(x + attn, g1_ref[...], b1_ref[...])

    # TODO(synk): at large E/F, K-tile w1/w2 along a reduction grid axis
    # instead of holding the full weights (VMEM discipline for v5e/v7x).
    h = jnp.dot(y.astype(jnp.bfloat16), w1_ref[...],
                preferred_element_type=jnp.float32) + bf1_ref[...]
    h = jnp.maximum(h, 0.0)                                        # ReLU (f32)
    h2 = jnp.dot(h.astype(jnp.bfloat16), w2_ref[...],
                 preferred_element_type=jnp.float32) + bf2_ref[...]
    z = _layernorm_f32(y + h2, g2_ref[...], b2_ref[...])

    if apply_final_norm:                       # fused final encoder LayerNorm
        z = _layernorm_f32(z, gf_ref[...], bff_ref[...])
    o_ref[...] = z.astype(o_ref.dtype)


# --------------------------------------------------------------------------
# Wrappers
# --------------------------------------------------------------------------
_VMEM_LIMIT = 32 * 1024 * 1024     # safe on v5e / v6e / v7x at these tiles


def _compiler_params(n_grid_dims):
    return pltpu.CompilerParams(
        dimension_semantics=("parallel",) * n_grid_dims,
        vmem_limit_bytes=_VMEM_LIMIT)


def _row_tile(n_rows, max_tile=256):
    """Largest tile <= max_tile dividing n_rows (multiple of 8 when tiled)."""
    if n_rows <= max_tile:
        return n_rows
    start = (max_tile // 8) * 8
    for t in range(start, 0, -8):
        if n_rows % t == 0:
            return t
    return n_rows


def encoder_layer(x_rows, p, num_heads, batch, seq, final_norm=None):
    """x_rows: (B*S, E) bf16 batch-major rows -> (B*S, E) bf16."""
    BS, E = x_rows.shape
    F = p["w1"].shape[1]
    TM = _row_tile(BS, max_tile=256)          # M tile for the dense matmuls
    n_row = BS // TM

    # ---- 1) QKV projection, row-tiled over B*S ---------------------------
    qkv = pl.pallas_call(
        qkv_proj_kernel,
        out_shape=jax.ShapeDtypeStruct((BS, 3 * E), jnp.bfloat16),
        grid=(n_row,),
        in_specs=[
            pl.BlockSpec((TM, E), lambda i: (i, 0)),
            pl.BlockSpec((E, 3 * E), lambda i: (0, 0)),
            pl.BlockSpec((1, 3 * E), lambda i: (0, 0)),
        ],
        out_specs=pl.BlockSpec((TM, 3 * E), lambda i: (i, 0)),
        compiler_params=_compiler_params(1),
    )(x_rows, p["wqkv"], p["bqkv"])

    # ---- 2) attention on a (batch, q-tile) grid ---------------------------
    qkv_b = qkv.reshape(batch, seq, 3 * E)     # contiguous -> free reshape
    TQ = _row_tile(seq, max_tile=128)
    n_q = seq // TQ
    ctx = pl.pallas_call(
        functools.partial(attention_kernel, num_heads=num_heads),
        out_shape=jax.ShapeDtypeStruct((batch, seq, E), jnp.bfloat16),
        grid=(batch, n_q),
        in_specs=[
            pl.BlockSpec((1, TQ, 3 * E), lambda b, qi: (b, qi, 0)),  # q rows
            pl.BlockSpec((1, seq, 3 * E), lambda b, qi: (b, 0, 0)),  # full K/V
        ],
        out_specs=pl.BlockSpec((1, TQ, E), lambda b, qi: (b, qi, 0)),
        compiler_params=_compiler_params(2),
    )(qkv_b, qkv_b)

    # ---- 3) out-proj + residual + LN1 + FFN + residual + LN2 --------------
    apply_final = final_norm is not None
    gf = final_norm["gamma"] if apply_final else jnp.ones((1, E), jnp.float32)
    bf = final_norm["beta"] if apply_final else jnp.zeros((1, E), jnp.float32)
    ctx_rows = ctx.reshape(BS, E)
    out = pl.pallas_call(
        functools.partial(post_attn_kernel, apply_final_norm=apply_final),
        out_shape=jax.ShapeDtypeStruct((BS, E), jnp.bfloat16),
        grid=(n_row,),
        in_specs=[
            pl.BlockSpec((TM, E), lambda i: (i, 0)),    # x (residual input)
            pl.BlockSpec((TM, E), lambda i: (i, 0)),    # attention context
            pl.BlockSpec((E, E), lambda i: (0, 0)),     # Wo
            pl.BlockSpec((1, E), lambda i: (0, 0)),     # bo
            pl.BlockSpec((1, E), lambda i: (0, 0)),     # LN1 gamma
            pl.BlockSpec((1, E), lambda i: (0, 0)),     # LN1 beta
            pl.BlockSpec((E, F), lambda i: (0, 0)),     # W1
            pl.BlockSpec((1, F), lambda i: (0, 0)),     # b1
            pl.BlockSpec((F, E), lambda i: (0, 0)),     # W2
            pl.BlockSpec((1, E), lambda i: (0, 0)),     # b2
            pl.BlockSpec((1, E), lambda i: (0, 0)),     # LN2 gamma
            pl.BlockSpec((1, E), lambda i: (0, 0)),     # LN2 beta
            pl.BlockSpec((1, E), lambda i: (0, 0)),     # final-norm gamma
            pl.BlockSpec((1, E), lambda i: (0, 0)),     # final-norm beta
        ],
        out_specs=pl.BlockSpec((TM, E), lambda i: (i, 0)),
        compiler_params=_compiler_params(1),
    )(x_rows, ctx_rows, p["wo"], p["bo"], p["g1"], p["bn1"],
      p["w1"], p["bf1"], p["w2"], p["bf2"], p["g2"], p["bn2"], gf, bf)
    return out


def my_transformer_encoder(src_sbe, layer_params, final_norm, num_heads):
    """src_sbe: (src_len, batch, embed) like PyTorch. Returns same layout."""
    S, B, E = src_sbe.shape
    # Single layout change at entry/exit (batch-major rows inside; one HBM
    # pass total, not one per layer).
    x = jnp.transpose(src_sbe, (1, 0, 2)).astype(jnp.bfloat16).reshape(B * S, E)
    n_layers = len(layer_params)
    for li, p in enumerate(layer_params):
        fuse = final_norm if li == n_layers - 1 else None
        x = encoder_layer(x, p, num_heads, B, S, final_norm=fuse)
    out = x.reshape(B, S, E).astype(src_sbe.dtype)
    return jnp.transpose(out, (1, 0, 2))


# --------------------------------------------------------------------------
# Deterministic parameter init (xavier_uniform-style)
# --------------------------------------------------------------------------
def xavier_uniform(key, shape):
    fan_in, fan_out = shape
    bound = math.sqrt(6.0 / (fan_in + fan_out))
    return jax.random.uniform(key, shape, jnp.float32, -bound, bound)


def make_layer_params(key, E, F):
    ks = jax.random.split(key, 4)
    # NOTE: layout is (in, out) and kernels compute x @ W; PyTorch stores
    # (out, in) and computes x @ W.T -> transpose when importing real weights.
    return {
        "wqkv": xavier_uniform(ks[0], (E, 3 * E)).astype(jnp.bfloat16),
        "bqkv": jnp.zeros((1, 3 * E), jnp.float32),
        "wo":   xavier_uniform(ks[1], (E, E)).astype(jnp.bfloat16),
        "bo":   jnp.zeros((1, E), jnp.float32),
        "g1":   jnp.ones((1, E), jnp.float32),
        "bn1":  jnp.zeros((1, E), jnp.float32),
        "w1":   xavier_uniform(ks[2], (E, F)).astype(jnp.bfloat16),
        "bf1":  jnp.zeros((1, F), jnp.float32),
        "w2":   xavier_uniform(ks[3], (F, E)).astype(jnp.bfloat16),
        "bf2":  jnp.zeros((1, E), jnp.float32),
        "g2":   jnp.ones((1, E), jnp.float32),
        "bn2":  jnp.zeros((1, E), jnp.float32),
    }


# --------------------------------------------------------------------------
if __name__ == "__main__":
    SRC_LEN, BATCH, EMBED = 16, 2, 128       # lane-dense: EMBED % 128 == 0
    NUM_HEADS, FFN, NUM_LAYERS = 4, 256, 2

    root = jax.random.PRNGKey(0)
    k_in, k_params = jax.random.split(root)

    # PyTorch-convention input: [src_len, batch_size, embed_dim]
    src = jax.random.normal(k_in, (SRC_LEN, BATCH, EMBED), jnp.float32)

    layer_keys = jax.random.split(k_params, NUM_LAYERS)
    layer_params = [make_layer_params(k, EMBED, FFN) for k in layer_keys]
    final_norm = {"gamma": jnp.ones((1, EMBED), jnp.float32),
                  "beta": jnp.zeros((1, EMBED), jnp.float32)}

    out = my_transformer_encoder(src, layer_params, final_norm, NUM_HEADS)
    out = jax.block_until_ready(out)
    assert out.shape == (SRC_LEN, BATCH, EMBED)
    assert bool(jnp.all(jnp.isfinite(out)))
    print("KERNEL_OK")
</pallas_src>

<mosaic_0001>
module attributes {stable_mosaic.version = 11 : i64} {
  func.func @qkv_proj_kernel(%arg0: i32, %arg1: memref<32x128xbf16, #tpu.memory_space<vmem>>, %arg2: memref<128x384xbf16, #tpu.memory_space<vmem>>, %arg3: memref<1x384xf32, #tpu.memory_space<vmem>>, %arg4: memref<32x384xbf16, #tpu.memory_space<vmem>>) attributes {dimension_semantics = [#tpu.dimension_semantics<parallel>], iteration_bounds = array<i64: 1>, scalar_prefetch = 0 : i64, scratch_operands = 0 : i64, tpu.core_type = #tpu.core_type<tc>, window_params = [{transform_indices = @transform_0, window_bounds = array<i64: 32, 128>}, {pipeline_mode = #tpu.pipeline_mode<synchronous>, transform_indices = @transform_1, window_bounds = array<i64: 128, 384>}, {pipeline_mode = #tpu.pipeline_mode<synchronous>, transform_indices = @transform_2, window_bounds = array<i64: 1, 384>}, {transform_indices = @transform_3, window_bounds = array<i64: 32, 384>}]} {
    %c0 = arith.constant 0 : index
    %c0_0 = arith.constant 0 : index
    %0 = vector.load %arg1[%c0, %c0_0] : memref<32x128xbf16, #tpu.memory_space<vmem>>, vector<32x128xbf16>
    %c0_1 = arith.constant 0 : index
    %c0_2 = arith.constant 0 : index
    %1 = vector.load %arg2[%c0_1, %c0_2] : memref<128x384xbf16, #tpu.memory_space<vmem>>, vector<128x384xbf16>
    %cst = arith.constant dense<0.000000e+00> : vector<32x384xf32>
    %2 = tpu.matmul %0, %1, %cst {dimension_numbers = #tpu.dot_dimension_numbers<[1], [0], [0], [1], [0, 0, 1, 1], [], []>} : vector<32x128xbf16>, vector<128x384xbf16>, vector<32x384xf32> -> vector<32x384xf32>
    %c0_3 = arith.constant 0 : index
    %c0_4 = arith.constant 0 : index
    %3 = vector.load %arg3[%c0_3, %c0_4] : memref<1x384xf32, #tpu.memory_space<vmem>>, vector<1x384xf32>
    %4 = vector.broadcast %3 : vector<1x384xf32> to vector<32x384xf32>
    %5 = arith.addf %2, %4 : vector<32x384xf32>
    %6 = arith.truncf %5 : vector<32x384xf32> to vector<32x384xbf16>
    %c0_5 = arith.constant 0 : index
    %c0_6 = arith.constant 0 : index
    %7 = vector.load %arg4[%c0_5, %c0_6] : memref<32x384xbf16, #tpu.memory_space<vmem>>, vector<32x384xbf16>
    tpu.vector_store %arg4[%c0_5, %c0_6], %6 {strides = array<i32>} : memref<32x384xbf16, #tpu.memory_space<vmem>>, vector<32x384xbf16>,
    return
  }
  func.func @transform_0(%arg0: i32) -> (i32, i32) {
    %c0_i32 = arith.constant 0 : i32
    %c0_i32_0 = arith.constant 0 : i32
    return %arg0, %c0_i32 : i32, i32
  }
  func.func @transform_1(%arg0: i32) -> (i32, i32) {
    %c0_i32 = arith.constant 0 : i32
    %c0_i32_0 = arith.constant 0 : i32
    %c0_i32_1 = arith.constant 0 : i32
    return %c0_i32, %c0_i32_0 : i32, i32
  }
  func.func @transform_2(%arg0: i32) -> (i32, i32) {
    %c0_i32 = arith.constant 0 : i32
    %c0_i32_0 = arith.constant 0 : i32
    %c0_i32_1 = arith.constant 0 : i32
    return %c0_i32, %c0_i32_0 : i32, i32
  }
  func.func @transform_3(%arg0: i32) -> (i32, i32) {
    %c0_i32 = arith.constant 0 : i32
    %c0_i32_0 = arith.constant 0 : i32
    return %arg0, %c0_i32 : i32, i32
  }
}

</mosaic_0001>

<bundles_post_ra>
// kernel: tpu_custom_call.1
= control target key start
LH: loop header
LB: loop body
LE: loop exit
PB: predicated region body
PF: predicated region fallthrough
CT: control target
= control target key end

     0   :  { %8 = vsyncpa [#allocation3], 0  ;;  %s664_s0 = inlined_call_operand.hbm [shape: bf16[32,128], index: 0, kind: input, shape index: {}]   ;;  %s665_s1 = inlined_call_operand.hbm [shape: bf16[128,384], index: 1, kind: input, shape index: {}]   ;;  %s666_s2 = inlined_call_operand.vmem [shape: f32[1,384], index: 2, kind: input, shape index: {}]   ;;  %s667_s3 = inlined_call_operand.hbm [shape: bf16[32,384], index: 3, kind: output, shape index: {}]  }
   0x1   :  { %9 = vsyncpa [#allocation6], 0 }
   0x2   :  { %10 = vsyncpa [#allocation4], 0  ;;  %s591_s12 = smov [#allocation2]   ;;  %s519_s16 = scalar_lea.hbm %s664_s0, 256 }
   0x3   :  { %s16_s13 = sshll.u32 %s591_s12, 4  ;;  %p520_p0 = scmp.ne.s32.totalorder %s664_s0, %s519_s16  ;;  %s17_s13 = int_to_ptr.vmem [resolvable:$true] %s16_s13 }
   0x4   :  { %p523_p1 = scmp.lt.u32.totalorder %s519_s16, %s664_s0 }
   0x6   :  { %p525_p2 = pnand %p523_p1, %p520_p0 }
   0x8   :  { %528 = shalt.err (!%p525_p2)
}
   0x9   :  { %s529_s21 = scalar_lea.vmem %s17_s13, 256  ;;  %p534_p4 = scmp.lt.s32.totalorder %s17_s13, %s17_s13 }
   0xa   :  { %p530_p3 = scmp.ne.s32.totalorder %s17_s13, %s529_s21  ;;  %p535_p5 = scmp.lt.s32.totalorder %s529_s21, %s529_s21 }
   0xc   :  { %p536_p6 = por %p535_p5, %p534_p4 }
   0xe   :  { %p537_p7 = pnand %p536_p6, %p530_p3 }
  0x10   :  { %540 = shalt.err (!%p537_p7)
}
  0x11   :  { %s592_s22 = smov 64   ;;  %s593_s23 = smov 4  }
  0x12   :  { %22 = dma.hbm_to_vmem [thread:$0]  %s664_s0, 256, %s17_s13, [#allocation3], %s592_s22, %s592_s22, %s593_s23  }
  0x13   :  { %s594_s26 = smov [#allocation5]   ;;  %s541_s30 = scalar_lea.hbm %s665_s1, 3072 }
  0x14   :  { %s28_s27 = sshll.u32 %s594_s26, 4  ;;  %p542_p8 = scmp.ne.s32.totalorder %s665_s1, %s541_s30  ;;  %s29_s27 = int_to_ptr.vmem [resolvable:$true] %s28_s27 }
  0x15   :  { %p545_p9 = scmp.lt.u32.totalorder %s541_s30, %s665_s1 }
  0x17   :  { %p547_p10 = pnand %p545_p9, %p542_p8 }
  0x19   :  { %550 = shalt.err (!%p547_p10)
}
  0x1a   :  { %s551_s8 = scalar_lea.vmem %s29_s27, 3072  ;;  %p556_p12 = scmp.lt.s32.totalorder %s29_s27, %s29_s27 }
  0x1b   :  { %p552_p11 = scmp.ne.s32.totalorder %s29_s27, %s551_s8  ;;  %p557_p13 = scmp.lt.s32.totalorder %s551_s8, %s551_s8 }
  0x1d   :  { %p558_p0 = por %p557_p13, %p556_p12 }
  0x1f   :  { %p559_p1 = pnand %p558_p0, %p552_p11 }
  0x21   :  { %562 = shalt.err (!%p559_p1)
}
  0x22   :  { %s595_s0 = smov 192   ;;  %s596_s9 = smov 12  }
  0x23   :  { %34 = dma.hbm_to_vmem [thread:$0]  %s665_s1, 3072, %s29_s27, [#allocation6], %s595_s0, %s595_s0, %s596_s9  }
  0x24   :  { %585 = dma.done.wait [#allocation3], 256  }
  0x25   :  { %586 = vsyncadd [#allocation3], 4294967040 }
  0x26   :  { %587 = dma.done.wait [#allocation6], 3072  }
  0x27   :  { %588 = vsyncadd [#allocation6], 4294964224  ;;  %v597_v0 = vmov 0   ;;  %v485_v1 = vld [vmem:[#allocation5 + $0x4] ss:$12 sps:$4 sm:$0xff]   ;;  %v518_v26 = vld [vmem:[#allocation2 + $0x8] sm:$0xff]   ;;  %v82_v27 = vlaneseq }
  0x28   :  { %269 = vmatprep.mubr.bf16.mxu0 %v597_v0  ;;  %v487_v2 = vld [vmem:[#allocation5] ss:$12 sps:$4 sm:$0xff]   ;;  %237 = vmatprep.subr.bf16.mxu0 %v485_v1  ;;  %v488_v3 = vld [vmem:[#allocation5 + $0x1c] ss:$12 sps:$4 sm:$0xff]   ;;  %v490_v4 = vld [vmem:[#allocation5 + $0x18] ss:$12 sps:$4 sm:$0xff]  }
  0x29   :  { %238 = vmatpush1.bf16.msra.mxu0 %v487_v2  ;;  %v491_v5 = vld [vmem:[#allocation5 + $0x8] ss:$12 sps:$4 sm:$0xff]   ;;  %v495_v7 = vld [vmem:[#allocation5 + $0x20] ss:$12 sps:$4 sm:$0xff]   ;;  %v494_v8 = vld [vmem:[#allocation5 + $0x30] ss:$12 sps:$4 sm:$0xff]  }
  0x2a   :  { %239 = vmatprep.subr.bf16.mxu0 %v488_v3  ;;  %v492_v6 = vld [vmem:[#allocation5 + $0x34] ss:$12 sps:$4 sm:$0xff]   ;;  %457 = vmatprep.subr.bf16.mxu1 %v491_v5  ;;  %v496_v9 = vld [vmem:[#allocation5 + $0x4c] ss:$12 sps:$4 sm:$0xff]   ;;  %v503_v12 = vld [vmem:[#allocation5 + $0x50] ss:$12 sps:$4 sm:$0xff]  }
  0x2b   :  { %458 = vmatpush3.bf16.msra.mxu1 %v491_v5  ;;  %v499_v10 = vld [vmem:[#allocation5 + $0x38] ss:$12 sps:$4 sm:$0xff]   ;;  %v498_v11 = vld [vmem:[#allocation5 + $0x48] ss:$12 sps:$4 sm:$0xff]   ;;  %v502_v14 = vld [vmem:[#allocation5 + $0x60] ss:$12 sps:$4 sm:$0xff]  }
  0x2c   :  { %459 = vmatprep.subr.bf16.mxu1 %v495_v7  ;;  %v500_v13 = vld [vmem:[#allocation5 + $0x64] ss:$12 sps:$4 sm:$0xff]   ;;  %v507_v15 = vld [vmem:[#allocation5 + $0x68] ss:$12 sps:$4 sm:$0xff]   ;;  %v511_v19 = vld [vmem:[#allocation5 + $0x80] ss:$12 sps:$4 sm:$0xff]  }
  0x2d   :  { %240 = vmatpush1.bf16.msra.mxu0 %v490_v4  ;;  %v504_v16 = vld [vmem:[#allocation5 + $0x7c] ss:$12 sps:$4 sm:$0xff]   ;;  %v506_v17 = vld [vmem:[#allocation5 + $0x78] ss:$12 sps:$4 sm:$0xff]   ;;  %v516_v18 = vld [vmem:[#allocation2] sm:$0xff]   ;;  %v83_v28 = vshrl.u32 %v82_v27, 7 }
  0x2e   :  { %241 = vmatprep.subr.bf16.mxu0 %v492_v6  ;;  %v508_v20 = vld [vmem:[#allocation5 + $0x94] ss:$12 sps:$4 sm:$0xff]   ;;  %473 = vmatprep.mubr.bf16.mxu1 %v516_v18  ;;  %v510_v21 = vld [vmem:[#allocation5 + $0x90] ss:$12 sps:$4 sm:$0xff]   ;;  %v515_v22 = vld [vmem:[#allocation5 + $0x98] ss:$12 sps:$4 sm:$0xff]  }
  0x2f   :  { %460 = vmatpush3.bf16.msra.mxu1 %v495_v7  ;;  %v512_v23 = vld [vmem:[#allocation5 + $0xac] ss:$12 sps:$4 sm:$0xff]   ;;  %v514_v24 = vld [vmem:[#allocation5 + $0xa8] ss:$12 sps:$4 sm:$0xff]   ;;  %v517_v25 = vld [vmem:[#allocation5 + $0xb0] ss:$12 sps:$4 sm:$0xff]  }
  0x30   :  { %461 = vmatprep.subr.bf16.mxu1 %v499_v10  ;;  %v84_v29 = vsub.s32 0, %v83_v28  ;;  %v80_v30 = vld [vmem:[%s666_s2] sm:$0x7]  ;;  %v88_v31 = vsub.s32 1, %v83_v28  ;;  %v92_v32 = vsub.s32 2, %v83_v28  ;;  %s598_s2 = smov [#allocation7]  }
  0x31   :  { %242 = vmatpush1.bf16.msra.mxu0 %v494_v8  ;;  %s392_s13 = sshll.u32 %s598_s2, 4  ;;  %s393_s13 = int_to_ptr.vmem [resolvable:$true] %s392_s13 }
  0x32   :  { %243 = vmatprep.subr.bf16.mxu0 %v496_v9  ;;  %v85_v33 = vrot.slane %v80_v30, %v84_v29  ;;  %v89_v34 = vrot.slane %v80_v30, %v88_v31  ;;  %v93_v36 = vrot.slane %v80_v30, %v92_v32  ;;  %s563_s14 = scalar_lea.vmem %s393_s13, 768  ;;  %p568_p3 = scmp.lt.s32.totalorder %s393_s13, %s393_s13 }
  0x33   :  { %462 = vmatpush3.bf16.msra.mxu1 %v499_v10  ;;  %p564_p2 = scmp.ne.s32.totalorder %s393_s13, %s563_s14  ;;  %p569_p4 = scmp.lt.s32.totalorder %s563_s14, %s563_s14 }
  0x34   :  { %463 = vmatprep.subr.bf16.mxu1 %v503_v12 }
  0x35   :  { %244 = vmatpush1.bf16.msra.mxu0 %v498_v11  ;;  %p570_p5 = por %p569_p4, %p568_p3 }
  0x36   :  { %245 = vmatprep.subr.bf16.mxu0 %v500_v13 }
  0x37   :  { %464 = vmatpush3.bf16.msra.mxu1 %v503_v12  ;;  %p571_p6 = pnand %p570_p5, %p564_p2 }
  0x38   :  { %465 = vmatprep.subr.bf16.mxu1 %v507_v15 }
  0x39   :  { %246 = vmatpush1.bf16.msra.mxu0 %v502_v14 }
  0x3a   :  { %247 = vmatprep.subr.bf16.mxu0 %v504_v16 }
  0x3b   :  { %466 = vmatpush3.bf16.msra.mxu1 %v507_v15 }
  0x3c   :  { %467 = vmatprep.subr.bf16.mxu1 %v511_v19 }
  0x3d   :  { %248 = vmatpush1.bf16.msra.mxu0 %v506_v17 }
  0x3e   :  { %249 = vmatprep.subr.bf16.mxu0 %v508_v20 }
  0x3f   :  { %468 = vmatpush3.bf16.msra.mxu1 %v511_v19 }
  0x40   :  { %469 = vmatprep.subr.bf16.mxu1 %v515_v22 }
  0x41   :  { %250 = vmatpush1.bf16.msra.mxu0 %v510_v21 }
  0x42   :  { %251 = vmatprep.subr.bf16.mxu0 %v512_v23 }
  0x43   :  { %470 = vmatpush3.bf16.msra.mxu1 %v515_v22 }
  0x44   :  { %471 = vmatprep.subr.bf16.mxu1 %v517_v25 }
  0x45   :  { %252 = vmatpush1.bf16.msra.mxu0 %v514_v24 }
  0x47   :  { %472 = vmatpush3.bf16.msra.mxu1 %v517_v25 }
  0x48   :  { %270 = vmatmul.mubr.bf16.vlgmr.msra.gmra.mrb[0].mxu0 %v516_v18 }
  0x49   :  { %279 = vmatprep.mubr.bf16.mxu0 %v597_v0 }
  0x4a   :  { %474 = vmatmul.mubr.bf16.vlgmr.msra.gmra.mrb[0].mxu1 %v518_v26 }
  0x50   :  { %280 = vmatmul.mubr.bf16.gmra.mrb[4].mxu0 %v518_v26 }
 0x11b   :  { %v271_v35 = vpop.f32.mrb[0].mxu0 }
 0x11c   :  { %v272_v37 = vadd.f32 %v271_v35, %v85_v33  ;;  %v273_v38 = vpop.f32.mrb[1].mxu0 }
 0x11d   :  { %v274_v39 = vadd.f32 %v273_v38, %v89_v34  ;;  %v275_v40 = vpop.f32.mrb[2].mxu0  ;;  %v475_v43 = vpop.f32.mrb[0].mxu1 }
 0x11e   :  { %v276_v41 = vadd.f32 %v275_v40, %v85_v33  ;;  %v277_v42 = vpop.f32.mrb[3].mxu0  ;;  %v333_v46 = vadd.f32 %v475_v43, %v93_v36  ;;  %v324_v47 = vpop.f32.mrb[1].mxu1 }
 0x11f   :  { %v439_v44 = vpack.c.bf16 %v274_v39, %v272_v37  ;;  %v278_v45 = vadd.f32 %v277_v42, %v89_v34  ;;  %v325_v48 = vadd.f32 %v324_v47, %v93_v36  ;;  %v476_v49 = vpop.f32.mrb[2].mxu1 }
 0x120   :  { %v444_v51 = vpack.c.bf16 %v333_v46, %v333_v46  ;;  %v336_v52 = vadd.f32 %v476_v49, %v93_v36  ;;  %v327_v53 = vpop.f32.mrb[3].mxu1 }
 0x121   :  { %379 = vst [vmem:[#allocation7] sm:$0xff] %v439_v44  ;;  %v441_v50 = vpack.c.bf16 %v278_v45, %v276_v41  ;;  %v440_v54 = vpack.c.bf16 %v325_v48, %v325_v48  ;;  %v328_v55 = vadd.f32 %v327_v53, %v93_v36 }
 0x122   :  { %384 = vst [vmem:[#allocation7 + $0x20] sm:$0xf] %v444_v51  ;;  %v446_v56 = vpack.c.bf16 %v336_v52, %v336_v52 }
 0x123   :  { %381 = vst [vmem:[#allocation7 + $0xc] sm:$0xff] %v441_v50  ;;  %v281_v57 = vpop.f32.mrb[4].mxu0  ;;  %380 = vst [vmem:[#allocation7 + $0x8] sm:$0xf] %v440_v54  ;;  %v442_v59 = vpack.c.bf16 %v328_v55, %v328_v55 }
 0x124   :  { %v282_v58 = vadd.f32 %v281_v57, %v85_v33  ;;  %v283_v60 = vpop.f32.mrb[5].mxu0  ;;  %386 = vst [vmem:[#allocation7 + $0x2c] sm:$0xf] %v446_v56 }
 0x125   :  { %v284_v61 = vadd.f32 %v283_v60, %v89_v34  ;;  %v285_v62 = vpop.f32.mrb[6].mxu0  ;;  %382 = vst [vmem:[#allocation7 + $0x14] sm:$0xf] %v442_v59 }
 0x126   :  { %v286_v63 = vadd.f32 %v285_v62, %v85_v33  ;;  %v287_v0 = vpop.f32.mrb[7].mxu0 }
 0x127   :  { %v443_v1 = vpack.c.bf16 %v284_v61, %v282_v58  ;;  %v288_v2 = vadd.f32 %v287_v0, %v89_v34 }
 0x129   :  { %383 = vst [vmem:[#allocation7 + $0x18] sm:$0xff] %v443_v1  ;;  %v445_v3 = vpack.c.bf16 %v288_v2, %v286_v63 }
 0x12b   :  { %385 = vst [vmem:[#allocation7 + $0x24] sm:$0xff] %v445_v3 }
 0x12c   :  { %574 = shalt.err (!%p571_p6)
}
 0x12d   :  { %s575_s17 = scalar_lea.hbm %s667_s3, 768 }
 0x12e   :  { %p576_p7 = scmp.ne.s32.totalorder %s667_s3, %s575_s17  ;;  %p579_p8 = scmp.lt.u32.totalorder %s575_s17, %s667_s3 }
 0x130   :  { %p581_p9 = pnand %p579_p8, %p576_p7 }
 0x132   :  { %584 = shalt.err (!%p581_p9)
}
 0x133   :  { %398 = dma.vmem_to_hbm [thread:$0]  %s393_s13, 768, %s667_s3, [#allocation4], %s595_s0, %s595_s0, %s596_s9  }
 0x134   :  { %589 = dma.done.wait [#allocation4], 768  }
 0x135   :  { %590 = vsyncadd [#allocation4], 4294966528 }
 0x136   :  { %402 = vsyncpa [#allocation3], 1 }
 0x137   :  { %403 = vsyncpa [#allocation6], 1 }
 0x138   :  { %404 = vsyncpa [#allocation4], 1 }

</bundles_post_ra>
